<compile_context>
chip_gen: v5e
topology: v5e:2x2
jax: 0.10.0
libtpu: 0.0.40
codegen_flags: <defaults>
</compile_context>

<pallas_src>
import functools
import math

import numpy as np

import jax
import jax.numpy as jnp
from jax.experimental import pallas as pl
from jax.experimental.pallas import tpu as pltpu


def _round_up(n, m):
    return ((n + m - 1) // m) * m


def _bucket(n, minimum):
    """Static power-of-two buckets -> stable pallas_call shapes across calls."""
    n = max(int(n), 1)
    return max(1 << (n - 1).bit_length(), minimum)


# ----------------------------------------------------------------------------
# Kernel
# ----------------------------------------------------------------------------
def _make_kernel(d_real, head_dim, eps=1e-5):
    inv_d = 1.0 / float(d_real)
    inv_sqrt_hd = 1.0 / math.sqrt(float(head_dim))

    def kernel(x_ref, src_ref, tgt_ref, wqkv_ref, bqkv_ref, hsum_ref,
               w1_ref, b1_ref, w2_ref, b2_ref,
               g1_ref, be1_ref, g2_ref, be2_ref, o_ref):
        f32 = jnp.float32
        bf16 = jnp.bfloat16

        x = x_ref[...]                                  # (Np, Dp) f32
        np_, dp = x.shape
        ep = src_ref.shape[0]

        # --- fused QKV projection: one bf16 MXU dispatch, f32 accumulate -----
        qkv = jnp.dot(x.astype(bf16), wqkv_ref[...],
                      preferred_element_type=f32) + bqkv_ref[...]
        q = qkv[:, 0 * dp:1 * dp]
        kv = qkv[:, 1 * dp:3 * dp]                      # k | v, contiguous

        # --- one-hot gather matrices built in-kernel from index vectors ------
        # Padded edges carry index -1 -> all-zero one-hot rows.
        src_ids = src_ref[...]                          # (Ep, 1) int32
        tgt_ids = tgt_ref[...]
        node_iota = jax.lax.broadcasted_iota(jnp.int32, (ep, np_), 1)
        gsrc = jnp.where(node_iota == src_ids, 1.0, 0.0).astype(bf16)  # (Ep,Np)
        gtgt = jnp.where(node_iota == tgt_ids, 1.0, 0.0).astype(bf16)

        # --- edge gathers: q via gsrc; k|v merged into ONE matmul -------------
        q_e = jnp.dot(gsrc, q.astype(bf16), preferred_element_type=f32)
        kv_e = jnp.dot(gtgt, kv.astype(bf16), preferred_element_type=f32)
        k_e = kv_e[:, :dp]
        v_e = kv_e[:, dp:]

        # --- per-edge, per-head scores via constant 0/1 "head-sum" matmul -----
        scores = jnp.dot((q_e * k_e).astype(bf16), hsum_ref[...],
                         preferred_element_type=f32) * inv_sqrt_hd
        # Padded edges: -1e30 -> exp underflows to exactly 0 (f32 path).
        scores = jnp.where(src_ids >= 0, scores, -1e30)

        # --- softmax over the edge axis, per head (torch semantics, f32) ------
        m = jnp.max(scores, axis=0, keepdims=True)
        ex = jnp.exp(scores - m)
        p = ex * pl.reciprocal(jnp.sum(ex, axis=0, keepdims=True), approx=True)

        # --- per-source-node accumulated weights (transposed contraction),
        #     per-head scalar broadcast to D at NODE granularity (Np <= Ep),
        #     then expanded back to edges. Padded head columns are zeroed by
        #     hsum's zero rows; their exp/softmax work is intentional waste.
        w_node = jax.lax.dot_general(gsrc, p.astype(bf16),
                                     (((0,), (0,)), ((), ())),
                                     preferred_element_type=f32)       # (Np,Hp)
        node_full = jax.lax.dot_general(w_node.astype(bf16), hsum_ref[...],
                                        (((1,), (1,)), ((), ())),
                                        preferred_element_type=f32)    # (Np,Dp)
        a_full = jnp.dot(gsrc, node_full.astype(bf16),
                         preferred_element_type=f32)                   # (Ep,Dp)

        # --- weighted scatter-add of v back onto the source nodes -------------
        attn = jax.lax.dot_general(gsrc, (a_full * v_e).astype(bf16),
                                   (((0,), (0,)), ((), ())),
                                   preferred_element_type=f32)         # (Np,Dp)

        # TODO(synk): nn.Dropout(0.3) is identity at inference; a training-mode
        # variant would use pltpu.prng_seed / pltpu.prng_random_bits here.
        h = x + attn

        # --- LayerNorm 1: padded columns of h are exactly zero, so
        #     E[h^2] - mean^2 equals the true variance over the D real columns.
        mean1 = jnp.sum(h, axis=-1, keepdims=True) * inv_d
        var1 = jnp.maximum(jnp.sum(h * h, axis=-1, keepdims=True) * inv_d
                           - mean1 * mean1, 0.0)
        h1 = (h - mean1) * jax.lax.rsqrt(var1 + eps) * g1_ref[...] + be1_ref[...]

        # --- FFN: Linear(D, 4D) -> ReLU -> Linear(4D, D), bf16 MXU ------------
        f = jnp.dot(h1.astype(bf16), w1_ref[...],
                    preferred_element_type=f32) + b1_ref[...]
        f = jnp.maximum(f, 0.0)
        f2 = jnp.dot(f.astype(bf16), w2_ref[...],
                     preferred_element_type=f32) + b2_ref[...]

        # --- residual + LayerNorm 2, single fused lane-dense store ------------
        h2 = h1 + f2
        mean2 = jnp.sum(h2, axis=-1, keepdims=True) * inv_d
        var2 = jnp.maximum(jnp.sum(h2 * h2, axis=-1, keepdims=True) * inv_d
                           - mean2 * mean2, 0.0)
        o_ref[...] = ((h2 - mean2) * jax.lax.rsqrt(var2 + eps)
                      * g2_ref[...] + be2_ref[...])

    return kernel


# ----------------------------------------------------------------------------
# Parameter creation / one-time layout preparation
# ----------------------------------------------------------------------------
def init_params(key, input_size, num_heads):
    D = input_size
    assert D % num_heads == 0
    ks = jax.random.split(key, 10)
    lim_in = 1.0 / math.sqrt(D)
    lim_ff = 1.0 / math.sqrt(4 * D)
    u = jax.random.uniform
    return {
        "input_size": D,
        "num_heads": num_heads,
        "W_qkv": u(ks[0], (3 * D, D), jnp.float32, -lim_in, lim_in),
        "b_qkv": u(ks[1], (3 * D,), jnp.float32, -lim_in, lim_in),
        "W1": u(ks[2], (4 * D, D), jnp.float32, -lim_in, lim_in),
        "b1": u(ks[3], (4 * D,), jnp.float32, -lim_in, lim_in),
        "W2": u(ks[4], (D, 4 * D), jnp.float32, -lim_ff, lim_ff),
        "b2": u(ks[5], (D,), jnp.float32, -lim_ff, lim_ff),
        "g1": 1.0 + 0.05 * u(ks[6], (D,), jnp.float32, -1.0, 1.0),
        "be1": 0.05 * u(ks[7], (D,), jnp.float32, -1.0, 1.0),
        "g2": 1.0 + 0.05 * u(ks[8], (D,), jnp.float32, -1.0, 1.0),
        "be2": 0.05 * u(ks[9], (D,), jnp.float32, -1.0, 1.0),
    }


def prepare_operands(params):
    """One-time layout work: transposes + zero-padding + bf16 weight casts."""
    D = params["input_size"]
    H = params["num_heads"]
    hd = D // H
    Dp = _round_up(D, 128)
    Fp = _round_up(4 * D, 128)
    Hp = _round_up(H, 128)
    # NOTE(v6e/v7x): at MXU-bound scale prefer 256-multiple tiles (2x256x256 MXU);
    # 128-multiples kept here because this problem is latency-bound and tiny.

    wqkv = np.zeros((Dp, 3 * Dp), np.float32)
    bqkv = np.zeros((1, 3 * Dp), np.float32)
    wt = np.asarray(params["W_qkv"]).T               # (D, 3D): q | k | v columns
    bt = np.asarray(params["b_qkv"])
    for c in range(3):
        wqkv[:D, c * Dp:c * Dp + D] = wt[:, c * D:(c + 1) * D]
        bqkv[0, c * Dp:c * Dp + D] = bt[c * D:(c + 1) * D]

    head_sum = np.zeros((Dp, Hp), np.float32)        # sums each head's D-slice
    for j in range(D):
        head_sum[j, j // hd] = 1.0

    w1 = np.zeros((Dp, Fp), np.float32); w1[:D, :4 * D] = np.asarray(params["W1"]).T
    b1 = np.zeros((1, Fp), np.float32);  b1[0, :4 * D] = np.asarray(params["b1"])
    w2 = np.zeros((Fp, Dp), np.float32); w2[:4 * D, :D] = np.asarray(params["W2"]).T
    b2 = np.zeros((1, Dp), np.float32);  b2[0, :D] = np.asarray(params["b2"])

    def pad_row(v):
        out = np.zeros((1, Dp), np.float32)
        out[0, :D] = np.asarray(v)
        return jnp.asarray(out)

    return {
        "kernel": _make_kernel(D, hd),
        "D": D, "H": H, "head_dim": hd, "Dp": Dp, "Fp": Fp, "Hp": Hp,
        # bf16 MXU operands; biases & LayerNorm affine params stay f32.
        "wqkv": jnp.asarray(wqkv, jnp.bfloat16), "bqkv": jnp.asarray(bqkv),
        "head_sum": jnp.asarray(head_sum, jnp.bfloat16),
        "w1": jnp.asarray(w1, jnp.bfloat16), "b1": jnp.asarray(b1),
        "w2": jnp.asarray(w2, jnp.bfloat16), "b2": jnp.asarray(b2),
        "g1": pad_row(params["g1"]), "be1": pad_row(params["be1"]),
        "g2": pad_row(params["g2"]), "be2": pad_row(params["be2"]),
        "_fwd_cache": {},
    }


def _get_fwd(ops, N, D, Np, Ep):
    """Build (and cache) the jitted pad -> pallas_call -> slice path per bucket."""
    key = (N, D, Np, Ep)
    fwd = ops["_fwd_cache"].get(key)
    if fwd is not None:
        return fwd

    Dp = ops["Dp"]
    vmem = pl.BlockSpec(memory_space=pltpu.MemorySpace.VMEM)
    call = pl.pallas_call(
        ops["kernel"],
        out_shape=jax.ShapeDtypeStruct((Np, Dp), jnp.float32),
        in_specs=[vmem] * 14,
        out_specs=vmem,
        compiler_params=pltpu.CompilerParams(vmem_limit_bytes=32 * 1024 * 1024),
    )

    @jax.jit
    def fwd(x2d, src_ids, tgt_ids, wqkv, bqkv, hsum, w1, b1, w2, b2,
            g1, be1, g2, be2):
        xp = jnp.zeros((Np, Dp), jnp.float32).at[:N, :D].set(x2d)
        out = call(xp, src_ids, tgt_ids, wqkv, bqkv, hsum, w1, b1, w2, b2,
                   g1, be1, g2, be2)
        return out[:N, :D]

    ops["_fwd_cache"][key] = fwd
    return fwd


# ----------------------------------------------------------------------------
# Wrapper (per-call)
# ----------------------------------------------------------------------------
def transformer_block_forward(x, node_indices, adj_src, adj_tgt, ops):
    """x: (1, num_nodes, D) f32; node_indices: global graph ids of the rows."""
    if x.shape[0] != 1:
        raise ValueError("Sparse attention assumes batch_size=1")
    N, D = int(x.shape[1]), int(x.shape[2])
    assert D == ops["D"]

    # Host-side data-dependent edge filtering (mirrors the PyTorch dict logic).
    index_map = {int(g): i for i, g in enumerate(np.asarray(node_indices))}
    src_m, tgt_m = [], []
    for s, t in zip(np.asarray(adj_src), np.asarray(adj_tgt)):
        if int(s) in index_map and int(t) in index_map:
            src_m.append(index_map[int(s)])
            tgt_m.append(index_map[int(t)])
    E = len(src_m)

    # Static power-of-two buckets: no per-shape recompiles across calls.
    Np = _bucket(N, 8)
    Ep = _bucket(E, 8)

    src_ids = np.full((Ep, 1), -1, np.int32)     # -1 marks padded edges
    tgt_ids = np.full((Ep, 1), -1, np.int32)
    if E:
        src_ids[:E, 0] = np.asarray(src_m, np.int32)
        tgt_ids[:E, 0] = np.asarray(tgt_m, np.int32)

    fwd = _get_fwd(ops, N, D, Np, Ep)
    out = fwd(jnp.asarray(x[0]), jnp.asarray(src_ids), jnp.asarray(tgt_ids),
              ops["wqkv"], ops["bqkv"], ops["head_sum"],
              ops["w1"], ops["b1"], ops["w2"], ops["b2"],
              ops["g1"], ops["be1"], ops["g2"], ops["be2"])
    return out[None]


# ----------------------------------------------------------------------------
# Pure-JAX reference mirroring the PyTorch forward (dropout = identity)
# ----------------------------------------------------------------------------
def _reference(x, node_indices, adj_src, adj_tgt, params):
    hp = functools.partial(jnp.dot, precision=jax.lax.Precision.HIGHEST)
    D = params["input_size"]; H = params["num_heads"]; hd = D // H
    xs = x[0]
    N = xs.shape[0]

    index_map = {int(g): i for i, g in enumerate(np.asarray(node_indices))}
    src_m, tgt_m = [], []
    for s, t in zip(np.asarray(adj_src), np.asarray(adj_tgt)):
        if int(s) in index_map and int(t) in index_map:
            src_m.append(index_map[int(s)])
            tgt_m.append(index_map[int(t)])

    def layernorm(v, g, b):
        mu = jnp.mean(v, axis=-1, keepdims=True)
        var = jnp.mean((v - mu) ** 2, axis=-1, keepdims=True)
        return (v - mu) / jnp.sqrt(var + 1e-5) * g + b

    def ffn(z):
        return hp(jax.nn.relu(hp(z, params["W1"].T) + params["b1"]),
                  params["W2"].T) + params["b2"]

    qkv = hp(xs, params["W_qkv"].T) + params["b_qkv"]
    q, k, v = qkv[:, :D], qkv[:, D:2 * D], qkv[:, 2 * D:]
    q = q.reshape(N, H, hd); k = k.reshape(N, H, hd); v = v.reshape(N, H, hd)

    if len(src_m) == 0:
        h1 = layernorm(xs, params["g1"], params["be1"])
        return layernorm(h1 + ffn(h1), params["g2"], params["be2"])[None]

    src_j = jnp.asarray(np.asarray(src_m, np.int32))
    tgt_j = jnp.asarray(np.asarray(tgt_m, np.int32))
    q_e, k_e, v_e = q[src_j], k[tgt_j], v[tgt_j]
    scores = (q_e * k_e).sum(-1) / math.sqrt(hd)                  # (E, H)
    p = jax.nn.softmax(scores, axis=0)                            # over all edges
    w_node = jnp.zeros((N, H), jnp.float32).at[src_j].add(p)
    a_edge = w_node[src_j]                                        # (E, H)
    out = jnp.zeros((N, H, hd), jnp.float32).at[src_j].add(a_edge[..., None] * v_e)
    out = out.reshape(N, D)
    h1 = layernorm(xs + out, params["g1"], params["be1"])         # dropout = identity
    return layernorm(h1 + ffn(h1), params["g2"], params["be2"])[None]


# ----------------------------------------------------------------------------
if __name__ == "__main__":
    input_size = 32
    num_heads = 4
    total_graph_nodes = 16
    num_selected = 8

    key = jax.random.PRNGKey(0)
    kp, kx = jax.random.split(key)
    params = init_params(kp, input_size, num_heads)
    ops = prepare_operands(params)

    # deterministic sparse adjacency over the full graph: self loops + two rings
    adj = np.zeros((total_graph_nodes, total_graph_nodes), np.int32)
    for i in range(total_graph_nodes):
        adj[i, i] = 1
        adj[i, (i + 1) % total_graph_nodes] = 1
        adj[i, (i + 5) % total_graph_nodes] = 1
    adj_src, adj_tgt = np.nonzero(adj)

    # the 8 rows of x correspond to these global graph node ids
    node_indices = np.array([3, 0, 7, 2, 9, 12, 5, 14], np.int32)
    x = jax.random.normal(kx, (1, num_selected, input_size), jnp.float32)

    out = transformer_block_forward(x, node_indices, adj_src, adj_tgt, ops)
    out = jax.block_until_ready(out)

    ref = _reference(x, node_indices, adj_src, adj_tgt, params)
    assert out.shape == (1, num_selected, input_size)
    # Tolerance covers bf16 MXU operands vs the f32 HIGHEST-precision reference;
    # a semantic bug would produce O(1) errors.
    assert jnp.allclose(out, ref, atol=3e-2, rtol=3e-2), "mismatch vs reference"
    print("KERNEL_OK")
</pallas_src>

<mosaic_0001>
module attributes {stable_mosaic.version = 11 : i64} {
  func.func @kernel(%arg0: memref<8x128xf32, #tpu.memory_space<vmem>>, %arg1: memref<16x1xi32, #tpu.memory_space<vmem>>, %arg2: memref<16x1xi32, #tpu.memory_space<vmem>>, %arg3: memref<128x384xbf16, #tpu.memory_space<vmem>>, %arg4: memref<1x384xf32, #tpu.memory_space<vmem>>, %arg5: memref<128x128xbf16, #tpu.memory_space<vmem>>, %arg6: memref<128x128xbf16, #tpu.memory_space<vmem>>, %arg7: memref<1x128xf32, #tpu.memory_space<vmem>>, %arg8: memref<128x128xbf16, #tpu.memory_space<vmem>>, %arg9: memref<1x128xf32, #tpu.memory_space<vmem>>, %arg10: memref<1x128xf32, #tpu.memory_space<vmem>>, %arg11: memref<1x128xf32, #tpu.memory_space<vmem>>, %arg12: memref<1x128xf32, #tpu.memory_space<vmem>>, %arg13: memref<1x128xf32, #tpu.memory_space<vmem>>, %arg14: memref<8x128xf32, #tpu.memory_space<vmem>>) attributes {dimension_semantics = [], scalar_prefetch = 0 : i64, scratch_operands = 0 : i64, tpu.core_type = #tpu.core_type<tc>} {
    %c0 = arith.constant 0 : index
    %c0_0 = arith.constant 0 : index
    %0 = vector.load %arg0[%c0, %c0_0] : memref<8x128xf32, #tpu.memory_space<vmem>>, vector<8x128xf32>
    %1 = arith.truncf %0 : vector<8x128xf32> to vector<8x128xbf16>
    %c0_1 = arith.constant 0 : index
    %c0_2 = arith.constant 0 : index
    %2 = vector.load %arg3[%c0_1, %c0_2] : memref<128x384xbf16, #tpu.memory_space<vmem>>, vector<128x384xbf16>
    %cst = arith.constant dense<0.000000e+00> : vector<8x384xf32>
    %3 = tpu.matmul %1, %2, %cst {dimension_numbers = #tpu.dot_dimension_numbers<[1], [0], [0], [1], [0, 0, 1, 1], [], []>} : vector<8x128xbf16>, vector<128x384xbf16>, vector<8x384xf32> -> vector<8x384xf32>
    %c0_3 = arith.constant 0 : index
    %c0_4 = arith.constant 0 : index
    %4 = vector.load %arg4[%c0_3, %c0_4] : memref<1x384xf32, #tpu.memory_space<vmem>>, vector<1x384xf32>
    %5 = vector.broadcast %4 : vector<1x384xf32> to vector<8x384xf32>
    %6 = arith.addf %3, %5 : vector<8x384xf32>
    %7 = vector.extract_strided_slice %6 {offsets = [0, 0], sizes = [8, 128], strides = [1, 1]} : vector<8x384xf32> to vector<8x128xf32>
    %8 = vector.extract_strided_slice %6 {offsets = [0, 128], sizes = [8, 256], strides = [1, 1]} : vector<8x384xf32> to vector<8x256xf32>
    %c0_5 = arith.constant 0 : index
    %c0_6 = arith.constant 0 : index
    %9 = vector.load %arg1[%c0_5, %c0_6] : memref<16x1xi32, #tpu.memory_space<vmem>>, vector<16x1xi32>
    %c0_7 = arith.constant 0 : index
    %c0_8 = arith.constant 0 : index
    %10 = vector.load %arg2[%c0_7, %c0_8] : memref<16x1xi32, #tpu.memory_space<vmem>>, vector<16x1xi32>
    %11 = tpu.iota {dimensions = array<i32: 1>} : vector<16x8xi32>
    %12 = vector.broadcast %9 : vector<16x1xi32> to vector<16x8xi32>
    %13 = arith.cmpi eq, %11, %12 : vector<16x8xi32>
    %cst_9 = arith.constant 1.000000e+00 : f32
    %cst_10 = arith.constant 0.000000e+00 : f32
    %14 = vector.broadcast %cst_9 : f32 to vector<16x8xf32>
    %15 = vector.broadcast %cst_10 : f32 to vector<16x8xf32>
    %16 = arith.select %13, %14, %15 : vector<16x8xi1>, vector<16x8xf32>
    %17 = arith.truncf %16 : vector<16x8xf32> to vector<16x8xbf16>
    %18 = vector.broadcast %10 : vector<16x1xi32> to vector<16x8xi32>
    %19 = arith.cmpi eq, %11, %18 : vector<16x8xi32>
    %cst_11 = arith.constant 1.000000e+00 : f32
    %cst_12 = arith.constant 0.000000e+00 : f32
    %20 = vector.broadcast %cst_11 : f32 to vector<16x8xf32>
    %21 = vector.broadcast %cst_12 : f32 to vector<16x8xf32>
    %22 = arith.select %19, %20, %21 : vector<16x8xi1>, vector<16x8xf32>
    %23 = arith.truncf %22 : vector<16x8xf32> to vector<16x8xbf16>
    %24 = arith.truncf %7 : vector<8x128xf32> to vector<8x128xbf16>
    %cst_13 = arith.constant dense<0.000000e+00> : vector<16x128xf32>
    %25 = tpu.matmul %17, %24, %cst_13 {dimension_numbers = #tpu.dot_dimension_numbers<[1], [0], [0], [1], [0, 0, 1, 1], [], []>} : vector<16x8xbf16>, vector<8x128xbf16>, vector<16x128xf32> -> vector<16x128xf32>
    %26 = arith.truncf %8 : vector<8x256xf32> to vector<8x256xbf16>
    %cst_14 = arith.constant dense<0.000000e+00> : vector<16x256xf32>
    %27 = tpu.matmul %23, %26, %cst_14 {dimension_numbers = #tpu.dot_dimension_numbers<[1], [0], [0], [1], [0, 0, 1, 1], [], []>} : vector<16x8xbf16>, vector<8x256xbf16>, vector<16x256xf32> -> vector<16x256xf32>
    %28 = vector.extract_strided_slice %27 {offsets = [0, 0], sizes = [16, 128], strides = [1, 1]} : vector<16x256xf32> to vector<16x128xf32>
    %29 = vector.extract_strided_slice %27 {offsets = [0, 128], sizes = [16, 128], strides = [1, 1]} : vector<16x256xf32> to vector<16x128xf32>
    %30 = arith.mulf %25, %28 : vector<16x128xf32>
    %31 = arith.truncf %30 : vector<16x128xf32> to vector<16x128xbf16>
    %c0_15 = arith.constant 0 : index
    %c0_16 = arith.constant 0 : index
    %32 = vector.load %arg5[%c0_15, %c0_16] : memref<128x128xbf16, #tpu.memory_space<vmem>>, vector<128x128xbf16>
    %cst_17 = arith.constant dense<0.000000e+00> : vector<16x128xf32>
    %33 = tpu.matmul %31, %32, %cst_17 {dimension_numbers = #tpu.dot_dimension_numbers<[1], [0], [0], [1], [0, 0, 1, 1], [], []>} : vector<16x128xbf16>, vector<128x128xbf16>, vector<16x128xf32> -> vector<16x128xf32>
    %cst_18 = arith.constant 0.353553385 : f32
    %34 = vector.broadcast %cst_18 : f32 to vector<16x128xf32>
    %35 = arith.mulf %33, %34 : vector<16x128xf32>
    %c0_i32 = arith.constant 0 : i32
    %36 = vector.broadcast %c0_i32 : i32 to vector<16x1xi32>
    %37 = arith.cmpi sge, %9, %36 : vector<16x1xi32>
    %cst_19 = arith.constant -1.000000e+30 : f32
    %38 = vector.shape_cast %37 : vector<16x1xi1> to vector<16x1xi1>
    %39 = vector.broadcast %38 : vector<16x1xi1> to vector<16x128xi1>
    %40 = vector.broadcast %cst_19 : f32 to vector<16x128xf32>
    %41 = arith.select %39, %35, %40 : vector<16x128xi1>, vector<16x128xf32>
    %cst_20 = arith.constant dense<0xFF800000> : vector<128xf32>
    %42 = vector.multi_reduction <maximumf>, %41, %cst_20 [0] : vector<16x128xf32> to vector<128xf32>
    %43 = vector.shape_cast %42 : vector<128xf32> to vector<1x128xf32>
    %44 = vector.broadcast %43 : vector<1x128xf32> to vector<16x128xf32>
    %45 = arith.subf %41, %44 : vector<16x128xf32>
    %46 = math.exp %45 : vector<16x128xf32>
    %cst_21 = arith.constant dense<0.000000e+00> : vector<128xf32>
    %47 = vector.multi_reduction <add>, %46, %cst_21 [0] : vector<16x128xf32> to vector<128xf32>
    %48 = vector.shape_cast %47 : vector<128xf32> to vector<1x128xf32>
    %49 = tpu.reciprocal %48 {approx = true} : vector<1x128xf32> -> vector<1x128xf32>
    %50 = vector.broadcast %49 : vector<1x128xf32> to vector<16x128xf32>
    %51 = arith.mulf %46, %50 : vector<16x128xf32>
    %52 = arith.truncf %51 : vector<16x128xf32> to vector<16x128xbf16>
    %cst_22 = arith.constant dense<0.000000e+00> : vector<8x128xf32>
    %53 = tpu.matmul %17, %52, %cst_22 {dimension_numbers = #tpu.dot_dimension_numbers<[0], [0], [1], [1], [0, 1, 1, 1], [], []>} : vector<16x8xbf16>, vector<16x128xbf16>, vector<8x128xf32> -> vector<8x128xf32>
    %54 = arith.truncf %53 : vector<8x128xf32> to vector<8x128xbf16>
    %c0_23 = arith.constant 0 : index
    %c0_24 = arith.constant 0 : index
    %55 = vector.load %arg5[%c0_23, %c0_24] : memref<128x128xbf16, #tpu.memory_space<vmem>>, vector<128x128xbf16>
    %cst_25 = arith.constant dense<0.000000e+00> : vector<8x128xf32>
    %56 = tpu.matmul %54, %55, %cst_25 {dimension_numbers = #tpu.dot_dimension_numbers<[1], [1], [0], [0], [0, 0, 1, 0], [], []>} : vector<8x128xbf16>, vector<128x128xbf16>, vector<8x128xf32> -> vector<8x128xf32>
    %57 = arith.truncf %56 : vector<8x128xf32> to vector<8x128xbf16>
    %cst_26 = arith.constant dense<0.000000e+00> : vector<16x128xf32>
    %58 = tpu.matmul %17, %57, %cst_26 {dimension_numbers = #tpu.dot_dimension_numbers<[1], [0], [0], [1], [0, 0, 1, 1], [], []>} : vector<16x8xbf16>, vector<8x128xbf16>, vector<16x128xf32> -> vector<16x128xf32>
    %59 = arith.mulf %58, %29 : vector<16x128xf32>
    %60 = arith.truncf %59 : vector<16x128xf32> to vector<16x128xbf16>
    %cst_27 = arith.constant dense<0.000000e+00> : vector<8x128xf32>
    %61 = tpu.matmul %17, %60, %cst_27 {dimension_numbers = #tpu.dot_dimension_numbers<[0], [0], [1], [1], [0, 1, 1, 1], [], []>} : vector<16x8xbf16>, vector<16x128xbf16>, vector<8x128xf32> -> vector<8x128xf32>
    %62 = arith.addf %0, %61 : vector<8x128xf32>
    %cst_28 = arith.constant dense<0.000000e+00> : vector<8xf32>
    %63 = vector.multi_reduction <add>, %62, %cst_28 [1] : vector<8x128xf32> to vector<8xf32>
    %64 = vector.shape_cast %63 : vector<8xf32> to vector<8x1xf32>
    %cst_29 = arith.constant 3.125000e-02 : f32
    %65 = vector.broadcast %cst_29 : f32 to vector<8x1xf32>
    %66 = arith.mulf %64, %65 : vector<8x1xf32>
    %67 = arith.mulf %62, %62 : vector<8x128xf32>
    %cst_30 = arith.constant dense<0.000000e+00> : vector<8xf32>
    %68 = vector.multi_reduction <add>, %67, %cst_30 [1] : vector<8x128xf32> to vector<8xf32>
    %69 = vector.shape_cast %68 : vector<8xf32> to vector<8x1xf32>
    %cst_31 = arith.constant 3.125000e-02 : f32
    %70 = vector.broadcast %cst_31 : f32 to vector<8x1xf32>
    %71 = arith.mulf %69, %70 : vector<8x1xf32>
    %72 = arith.mulf %66, %66 : vector<8x1xf32>
    %73 = arith.subf %71, %72 : vector<8x1xf32>
    %cst_32 = arith.constant 0.000000e+00 : f32
    %74 = vector.broadcast %cst_32 : f32 to vector<8x1xf32>
    %75 = arith.maximumf %73, %74 : vector<8x1xf32>
    %76 = vector.broadcast %66 : vector<8x1xf32> to vector<8x128xf32>
    %77 = arith.subf %62, %76 : vector<8x128xf32>
    %cst_33 = arith.constant 9.99999974E-6 : f32
    %78 = vector.broadcast %cst_33 : f32 to vector<8x1xf32>
    %79 = arith.addf %75, %78 : vector<8x1xf32>
    %80 = math.rsqrt %79 : vector<8x1xf32>
    %81 = vector.broadcast %80 : vector<8x1xf32> to vector<8x128xf32>
    %82 = arith.mulf %77, %81 : vector<8x128xf32>
    %c0_34 = arith.constant 0 : index
    %c0_35 = arith.constant 0 : index
    %83 = vector.load %arg10[%c0_34, %c0_35] : memref<1x128xf32, #tpu.memory_space<vmem>>, vector<1x128xf32>
    %84 = vector.broadcast %83 : vector<1x128xf32> to vector<8x128xf32>
    %85 = arith.mulf %82, %84 : vector<8x128xf32>
    %c0_36 = arith.constant 0 : index
    %c0_37 = arith.constant 0 : index
    %86 = vector.load %arg11[%c0_36, %c0_37] : memref<1x128xf32, #tpu.memory_space<vmem>>, vector<1x128xf32>
    %87 = vector.broadcast %86 : vector<1x128xf32> to vector<8x128xf32>
    %88 = arith.addf %85, %87 : vector<8x128xf32>
    %89 = arith.truncf %88 : vector<8x128xf32> to vector<8x128xbf16>
    %c0_38 = arith.constant 0 : index
    %c0_39 = arith.constant 0 : index
    %90 = vector.load %arg6[%c0_38, %c0_39] : memref<128x128xbf16, #tpu.memory_space<vmem>>, vector<128x128xbf16>
    %cst_40 = arith.constant dense<0.000000e+00> : vector<8x128xf32>
    %91 = tpu.matmul %89, %90, %cst_40 {dimension_numbers = #tpu.dot_dimension_numbers<[1], [0], [0], [1], [0, 0, 1, 1], [], []>} : vector<8x128xbf16>, vector<128x128xbf16>, vector<8x128xf32> -> vector<8x128xf32>
    %c0_41 = arith.constant 0 : index
    %c0_42 = arith.constant 0 : index
    %92 = vector.load %arg7[%c0_41, %c0_42] : memref<1x128xf32, #tpu.memory_space<vmem>>, vector<1x128xf32>
    %93 = vector.broadcast %92 : vector<1x128xf32> to vector<8x128xf32>
    %94 = arith.addf %91, %93 : vector<8x128xf32>
    %cst_43 = arith.constant 0.000000e+00 : f32
    %95 = vector.broadcast %cst_43 : f32 to vector<8x128xf32>
    %96 = arith.maximumf %94, %95 : vector<8x128xf32>
    %97 = arith.truncf %96 : vector<8x128xf32> to vector<8x128xbf16>
    %c0_44 = arith.constant 0 : index
    %c0_45 = arith.constant 0 : index
    %98 = vector.load %arg8[%c0_44, %c0_45] : memref<128x128xbf16, #tpu.memory_space<vmem>>, vector<128x128xbf16>
    %cst_46 = arith.constant dense<0.000000e+00> : vector<8x128xf32>
    %99 = tpu.matmul %97, %98, %cst_46 {dimension_numbers = #tpu.dot_dimension_numbers<[1], [0], [0], [1], [0, 0, 1, 1], [], []>} : vector<8x128xbf16>, vector<128x128xbf16>, vector<8x128xf32> -> vector<8x128xf32>
    %c0_47 = arith.constant 0 : index
    %c0_48 = arith.constant 0 : index
    %100 = vector.load %arg9[%c0_47, %c0_48] : memref<1x128xf32, #tpu.memory_space<vmem>>, vector<1x128xf32>
    %101 = vector.broadcast %100 : vector<1x128xf32> to vector<8x128xf32>
    %102 = arith.addf %99, %101 : vector<8x128xf32>
    %103 = arith.addf %88, %102 : vector<8x128xf32>
    %cst_49 = arith.constant dense<0.000000e+00> : vector<8xf32>
    %104 = vector.multi_reduction <add>, %103, %cst_49 [1] : vector<8x128xf32> to vector<8xf32>
    %105 = vector.shape_cast %104 : vector<8xf32> to vector<8x1xf32>
    %cst_50 = arith.constant 3.125000e-02 : f32
    %106 = vector.broadcast %cst_50 : f32 to vector<8x1xf32>
    %107 = arith.mulf %105, %106 : vector<8x1xf32>
    %108 = arith.mulf %103, %103 : vector<8x128xf32>
    %cst_51 = arith.constant dense<0.000000e+00> : vector<8xf32>
    %109 = vector.multi_reduction <add>, %108, %cst_51 [1] : vector<8x128xf32> to vector<8xf32>
    %110 = vector.shape_cast %109 : vector<8xf32> to vector<8x1xf32>
    %cst_52 = arith.constant 3.125000e-02 : f32
    %111 = vector.broadcast %cst_52 : f32 to vector<8x1xf32>
    %112 = arith.mulf %110, %111 : vector<8x1xf32>
    %113 = arith.mulf %107, %107 : vector<8x1xf32>
    %114 = arith.subf %112, %113 : vector<8x1xf32>
    %cst_53 = arith.constant 0.000000e+00 : f32
    %115 = vector.broadcast %cst_53 : f32 to vector<8x1xf32>
    %116 = arith.maximumf %114, %115 : vector<8x1xf32>
    %117 = vector.broadcast %107 : vector<8x1xf32> to vector<8x128xf32>
    %118 = arith.subf %103, %117 : vector<8x128xf32>
    %cst_54 = arith.constant 9.99999974E-6 : f32
    %119 = vector.broadcast %cst_54 : f32 to vector<8x1xf32>
    %120 = arith.addf %116, %119 : vector<8x1xf32>
    %121 = math.rsqrt %120 : vector<8x1xf32>
    %122 = vector.broadcast %121 : vector<8x1xf32> to vector<8x128xf32>
    %123 = arith.mulf %118, %122 : vector<8x128xf32>
    %c0_55 = arith.constant 0 : index
    %c0_56 = arith.constant 0 : index
    %124 = vector.load %arg12[%c0_55, %c0_56] : memref<1x128xf32, #tpu.memory_space<vmem>>, vector<1x128xf32>
    %125 = vector.broadcast %124 : vector<1x128xf32> to vector<8x128xf32>
    %126 = arith.mulf %123, %125 : vector<8x128xf32>
    %c0_57 = arith.constant 0 : index
    %c0_58 = arith.constant 0 : index
    %127 = vector.load %arg13[%c0_57, %c0_58] : memref<1x128xf32, #tpu.memory_space<vmem>>, vector<1x128xf32>
    %128 = vector.broadcast %127 : vector<1x128xf32> to vector<8x128xf32>
    %129 = arith.addf %126, %128 : vector<8x128xf32>
    %c0_59 = arith.constant 0 : index
    %c0_60 = arith.constant 0 : index
    %130 = vector.load %arg14[%c0_59, %c0_60] : memref<8x128xf32, #tpu.memory_space<vmem>>, vector<8x128xf32>
    tpu.vector_store %arg14[%c0_59, %c0_60], %129 {strides = array<i32>} : memref<8x128xf32, #tpu.memory_space<vmem>>, vector<8x128xf32>,
    return
  }
}

</mosaic_0001>

<bundles_post_ra>
// kernel: fwd.1
= control target key start
LH: loop header
LB: loop body
LE: loop exit
PB: predicated region body
PF: predicated region fallthrough
CT: control target
= control target key end

     0   :  { %19 = vsyncpa [#allocation3], 0  ;;  %s1440_s0 = inlined_call_operand.vmem [shape: f32[8,128], index: 0, kind: input, shape index: {}]   ;;  %s1441_s1 = inlined_call_operand.vmem [shape: s32[16,1], index: 1, kind: input, shape index: {}]   ;;  %s1442_s2 = inlined_call_operand.vmem [shape: s32[16,1], index: 2, kind: input, shape index: {}]   ;;  %s1443_s3 = inlined_call_operand.hbm [shape: bf16[128,384], index: 3, kind: input, shape index: {}]   ;;  %s1444_s4 = inlined_call_operand.vmem [shape: f32[1,384], index: 4, kind: input, shape index: {}]   ;;  %s1445_s5 = inlined_call_operand.hbm [shape: bf16[128,128], index: 5, kind: input, shape index: {}]   ;;  %s1446_s6 = inlined_call_operand.hbm [shape: bf16[128,128], index: 6, kind: input, shape index: {}]   ;;  %s1447_s7 = inlined_call_operand.vmem [shape: f32[1,128], index: 7, kind: input, shape index: {}]   ;;  %s1448_s8 = inlined_call_operand.hbm [shape: bf16[128,128], index: 8, kind: input, shape index: {}]   ;;  %s1449_s9 = inlined_call_operand.vmem [shape: f32[1,128], index: 9, kind: input, shape index: {}]   ;;  %s1450_s10 = inlined_call_operand.vmem [shape: f32[1,128], index: 10, kind: input, shape index: {}]   ;;  %s1451_s11 = inlined_call_operand.vmem [shape: f32[1,128], index: 11, kind: input, shape index: {}]   ;;  %s1452_s12 = inlined_call_operand.vmem [shape: f32[1,128], index: 12, kind: input, shape index: {}]   ;;  %s1453_s13 = inlined_call_operand.vmem [shape: f32[1,128], index: 13, kind: input, shape index: {}]   ;;  %s1454_s14 = inlined_call_operand.hbm [shape: f32[8,128], index: 14, kind: output, shape index: {}]  }
   0x1   :  { %20 = vsyncpa [#allocation6], 0 }
   0x2   :  { %21 = vsyncpa [#allocation9], 0  ;;  %s48_s15 = sshll.u32 %s1445_s5, 4  ;;  %s49_s15 = int_to_ptr.hbm [resolvable:$true] %s48_s15 }
   0x3   :  { %22 = vsyncpa [#allocation4], 0  ;;  %s1270_s16 = smov [#allocation5]   ;;  %s33_s20 = sshll.u32 %s1443_s3, 4  ;;  %s34_s20 = int_to_ptr.hbm [resolvable:$true] %s33_s20 }
   0x4   :  { %s50_s17 = sshll.u32 %s1270_s16, 4  ;;  %s1271_s21 = smov 64   ;;  %s51_s17 = int_to_ptr.vmem [resolvable:$true] %s50_s17 }
   0x5   :  { %s1272_s22 = smov 4   ;;  %s1273_s23 = smov [#allocation2]  }
   0x6   :  { %56 = dma.hbm_to_vmem [thread:$0]  %s49_s15, 1024, %s51_s17, [#allocation6], %s1271_s21, %s1271_s21, %s1272_s22  }
   0x7   :  { %s35_s24 = sshll.u32 %s1273_s23, 4  ;;  %s1274_s25 = smov 192   ;;  %s36_s24 = int_to_ptr.vmem [resolvable:$true] %s35_s24 }
   0x8   :  { %s1275_s26 = smov 12   ;;  %s61_s28 = sshll.u32 %s1446_s6, 4  ;;  %s62_s28 = int_to_ptr.hbm [resolvable:$true] %s61_s28 }
   0x9   :  { %41 = dma.hbm_to_vmem [thread:$0]  %s34_s20, 3072, %s36_s24, [#allocation3], %s1274_s25, %s1274_s25, %s1275_s26  }
   0xa   :  { %s1276_s29 = smov [#allocation7]   ;;  %s76_s18 = sshll.u32 %s1448_s8, 4  ;;  %s77_s18 = int_to_ptr.hbm [resolvable:$true] %s76_s18 }
   0xb   :  { %s63_s30 = sshll.u32 %s1276_s29, 4  ;;  %s1277_s15 = smov [#allocation8]   ;;  %s64_s30 = int_to_ptr.vmem [resolvable:$true] %s63_s30 }
   0xc   :  { %69 = dma.hbm_to_vmem [thread:$0]  %s62_s28, 1024, %s64_s30, [#allocation6], %s1271_s21, %s1271_s21, %s1272_s22  }
   0xd   :  { %s78_s17 = sshll.u32 %s1277_s15, 4  ;;  %s79_s17 = int_to_ptr.vmem [resolvable:$true] %s78_s17 }
   0xe   :  { %84 = dma.hbm_to_vmem [thread:$0]  %s77_s18, 1024, %s79_s17, [#allocation9], %s1271_s21, %s1271_s21, %s1272_s22  }
   0xf   :  { %1262 = dma.done.wait [#allocation3], 3072  }
  0x10   :  { %1263 = vsyncadd [#allocation3], 4294964224 }
  0x11   :  { %1264 = dma.done.wait [#allocation6], 2048  }
  0x12   :  { %1265 = vsyncadd [#allocation6], 4294965248 }
  0x13   :  { %1266 = dma.done.wait [#allocation9], 1024  }
  0x14   :  { %1267 = vsyncadd [#allocation9], 4294966272  ;;  %v952_v0 = vld [vmem:[#allocation2 + $0xa8] sm:$0xf]  ;;  %v1086_v1 = vld [vmem:[#allocation2 + $0xb0] sm:$0xf0] }
  0x15   :  { %v940_v2 = vld [vmem:[#allocation2 + $0x90] sm:$0xf]  ;;  %v1278_v3 = vmov 0   ;;  %v953_v4 = vor.u32 %v1086_v1, %v952_v0  ;;  %v1083_v5 = vld [vmem:[#allocation2 + $0x98] sm:$0xf0]  ;;  %v1374_v26 = vld [vmem:[%s1441_s1] sm:$0xff] }
  0x16   :  { %1123 = vset.pattern.permute.xlu0 %v1278_v3  ;;  %1124 = vset.pattern.permute.xlu1 %v1278_v3  ;;  %v1085_v6 = vld [vmem:[#allocation2 + $0xac] sm:$0xf]  ;;  %v954_v7 = vld [vmem:[#allocation2 + $0xb4] sm:$0xf0]  ;;  %v941_v8 = vor.u32 %v1083_v5, %v940_v2  ;;  %v1082_v10 = vld [vmem:[#allocation2 + $0x94] sm:$0xf] }
  0x17   :  { %1125 = vset.pattern.permute.xlu2 %v1278_v3  ;;  %282 = vmatpush.bf16.msra.mxu0 %v953_v4  ;;  %v957_v9 = vor.u32 %v1085_v6, %v954_v7  ;;  %v942_v11 = vld [vmem:[#allocation2 + $0x9c] sm:$0xf0]  ;;  %v928_v12 = vld [vmem:[#allocation2 + $0x78] sm:$0xf]  ;;  %v1080_v13 = vld [vmem:[#allocation2 + $0x80] sm:$0xf0] }
  0x18   :  { %v945_v14 = vor.u32 %v1082_v10, %v942_v11  ;;  %v1079_v15 = vld [vmem:[#allocation2 + $0x7c] sm:$0xf]  ;;  %v930_v16 = vld [vmem:[#allocation2 + $0x84] sm:$0xf0]  ;;  %v929_v17 = vor.u32 %v1080_v13, %v928_v12  ;;  %v916_v18 = vld [vmem:[#allocation2 + $0x60] sm:$0xf]  ;;  %328 = vperm.xlu0 %1123, %v1374_v26  }
  0x19   :  { %295 = vmatpush.bf16.msra.mxu1 %v957_v9  ;;  %v1077_v19 = vld [vmem:[#allocation2 + $0x68] sm:$0xf0]  ;;  %v960_v20 = vld [vmem:[#allocation2 + $0xb0] sm:$0xf]  ;;  %v1087_v21 = vld [vmem:[#allocation2 + $0xb8] sm:$0xf0]  ;;  %v933_v22 = vor.u32 %v1079_v15, %v930_v16  ;;  %v325_v16 = vlaneseq }
  0x1a   :  { %v1076_v23 = vld [vmem:[#allocation2 + $0x64] sm:$0xf]  ;;  %v918_v24 = vld [vmem:[#allocation2 + $0x6c] sm:$0xf0]  ;;  %v961_v25 = vor.u32 %v1087_v21, %v960_v20  ;;  %v948_v27 = vld [vmem:[#allocation2 + $0x98] sm:$0xf]  ;;  %v917_v29 = vor.u32 %v1077_v19, %v916_v18 }
  0x1b   :  { %283 = vmatpush.bf16.msra.mxu0 %v941_v8  ;;  %v1084_v28 = vld [vmem:[#allocation2 + $0xa0] sm:$0xf0]  ;;  %v904_v30 = vld [vmem:[#allocation2 + $0x48] sm:$0xf]  ;;  %v1074_v32 = vld [vmem:[#allocation2 + $0x50] sm:$0xf0]  ;;  %v921_v35 = vor.u32 %v1076_v23, %v918_v24 }
  0x1c   :  { %308 = vmatpush.bf16.msra.mxu2 %v961_v25  ;;  %v949_v31 = vor.u32 %v1084_v28, %v948_v27  ;;  %v936_v33 = vld [vmem:[#allocation2 + $0x80] sm:$0xf]  ;;  %v1081_v34 = vld [vmem:[#allocation2 + $0x88] sm:$0xf0]  ;;  %v906_v37 = vld [vmem:[#allocation2 + $0x54] sm:$0xf0]  ;;  %v905_v38 = vor.u32 %v1074_v32, %v904_v30 }
  0x1d   :  { %296 = vmatpush.bf16.msra.mxu1 %v945_v14  ;;  %v1073_v36 = vld [vmem:[#allocation2 + $0x4c] sm:$0xf]  ;;  %v892_v39 = vld [vmem:[#allocation2 + $0x30] sm:$0xf]  ;;  %v1071_v40 = vld [vmem:[#allocation2 + $0x38] sm:$0xf0]  ;;  %v937_v41 = vor.u32 %v1081_v34, %v936_v33 }
  0x1e   :  { %v323_v42 = vld [vmem:[%s1442_s2] sm:$0xff]  ;;  %v1070_v43 = vld [vmem:[#allocation2 + $0x34] sm:$0xf]  ;;  %v924_v44 = vld [vmem:[#allocation2 + $0x68] sm:$0xf]  ;;  %v909_v46 = vor.u32 %v1073_v36, %v906_v37  ;;  %v893_v49 = vor.u32 %v1071_v40, %v892_v39  ;;  %v326_v18 = vand.u32 127, %v325_v16 }
  0x1f   :  { %284 = vmatpush.bf16.msra.mxu0 %v929_v17  ;;  %v1078_v45 = vld [vmem:[#allocation2 + $0x70] sm:$0xf0]  ;;  %339 = vperm.xlu1 %1124, %v323_v42   ;;  %v894_v47 = vld [vmem:[#allocation2 + $0x3c] sm:$0xf0]  ;;  %v1383_v48 = vld [vmem:[%s1441_s1 + $0x8] sm:$0xff]  ;;  %v1279_v19 = vmov 0.0  }
  0x20   :  { %309 = vmatpush.bf16.msra.mxu2 %v949_v31  ;;  %v880_v50 = vld [vmem:[#allocation2 + $0x18] sm:$0xf]  ;;  %v925_v51 = vor.u32 %v1078_v45, %v924_v44  ;;  %v1068_v52 = vld [vmem:[#allocation2 + $0x20] sm:$0xf0]  ;;  %331 = vperm.xlu0 %1123, %v1383_v48   ;;  %v912_v53 = vld [vmem:[#allocation2 + $0x50] sm:$0xf]  ;;  %v897_v55 = vor.u32 %v1070_v43, %v894_v47 }
  0x21   :  { %297 = vmatpush.bf16.msra.mxu1 %v933_v22  ;;  %v1075_v54 = vld [vmem:[#allocation2 + $0x58] sm:$0xf0]  ;;  %v324_v56 = vld [vmem:[%s1442_s2 + $0x8] sm:$0xff]  ;;  %v881_v59 = vor.u32 %v1068_v52, %v880_v50  ;;  %v868_v60 = vld [vmem:[#allocation2] sm:$0xf]  ;;  %vm354_vm2 = vcmask 1043456  }
  0x22   :  { %v1067_v57 = vld [vmem:[#allocation2 + $0x1c] sm:$0xf]  ;;  %v882_v58 = vld [vmem:[#allocation2 + $0x24] sm:$0xf0]  ;;  %v913_v61 = vor.u32 %v1075_v54, %v912_v53  ;;  %v1065_v62 = vld [vmem:[#allocation2 + $0x8] sm:$0xf0] }
  0x23   :  { %285 = vmatpush.bf16.msra.mxu0 %v917_v29  ;;  %v900_v63 = vld [vmem:[#allocation2 + $0x38] sm:$0xf]  ;;  %v1072_v0 = vld [vmem:[#allocation2 + $0x40] sm:$0xf0]  ;;  %v885_v1 = vor.u32 %v1067_v57, %v882_v58  ;;  %v870_v4 = vld [vmem:[#allocation2 + $0xc] sm:$0xf0]  ;;  %v869_v5 = vor.u32 %v1065_v62, %v868_v60 }
  0x24   :  { %310 = vmatpush.bf16.msra.mxu2 %v937_v41  ;;  %v1064_v2 = vld [vmem:[#allocation2 + $0x4] sm:$0xf]  ;;  %v901_v7 = vor.u32 %v1072_v0, %v900_v63  ;;  %v888_v8 = vld [vmem:[#allocation2 + $0x20] sm:$0xf]  ;;  %v1069_v9 = vld [vmem:[#allocation2 + $0x28] sm:$0xf0] }
  0x25   :  { %298 = vmatpush.bf16.msra.mxu1 %v921_v35  ;;  %v1392_v6 = vld [vmem:[%s1440_s0] sm:$0xff]  ;;  %v873_v10 = vor.u32 %v1064_v2, %v870_v4  ;;  %v889_v12 = vor.u32 %v1069_v9, %v888_v8  ;;  %v876_v13 = vld [vmem:[#allocation2 + $0x8] sm:$0xf]  ;;  %v1066_v14 = vld [vmem:[#allocation2 + $0x10] sm:$0xf0]  ;;  %vm350_vm3 = vcmask 64512  }
  0x26   :  { %v113_v11 = vpack.c.bf16 %v1392_v6, %v1392_v6  ;;  %v877_v15 = vor.u32 %v1066_v14, %v876_v13  ;;  %v146_v24 = vld [vmem:[%s1444_s4] sm:$0x7]  ;;  %v1093_v52 = vld [vmem:[#allocation5 + $0x28] sm:$0xff]  ;;  %v1091_v54 = vld [vmem:[#allocation5 + $0x18] sm:$0xff]  ;;  %vm494_vm6 = vcmp.ge.s32.totalorder %v1374_v26, 0  ;;  %vm495_vm7 = vcmp.ge.s32.totalorder %v1383_v48, 0 }
  0x27   :  { %286 = vmatpush.bf16.msra.mxu0 %v905_v38  ;;  %342 = vperm.xlu1 %1124, %v324_v56   ;;  %v148_v25 = vperm.slane %v146_v24, 0  ;;  %v149_v27 = vperm.slane %v146_v24, 1  ;;  %v1095_v38 = vld [vmem:[#allocation5 + $0x38] sm:$0xff]  ;;  %v150_v40 = vperm.slane %v146_v24, 2  ;;  %v1092_v53 = vld [vmem:[#allocation5 + $0x20] sm:$0xff]  ;;  %v1089_v56 = vld [vmem:[#allocation5 + $0x8] sm:$0xff] }
  0x28   :  { %311 = vmatpush.bf16.msra.mxu2 %v925_v51  ;;  %v1094_v51 = vld [vmem:[#allocation5 + $0x30] sm:$0xff]  ;;  %v1088_v57 = vld [vmem:[#allocation5] sm:$0xff]  ;;  %v496_v60 = vsel %vm494_vm6, 1, %v1278_v3  ;;  %vm548_vm10 = vcmask 130048   ;;  %s1280_s3 = smov [#allocation10]   ;;  %s854_s6 = sshll.u32 %s1454_s14, 4  ;;  %s855_s6 = int_to_ptr.hbm [resolvable:$true] %s854_s6 }
  0x29   :  { %299 = vmatpush.bf16.msra.mxu1 %v909_v46  ;;  %499 = vperm.xlu2 %1125, %v496_v60   ;;  %v1098_v60 = vld [vmem:[#allocation7 + $0x10] sm:$0xff]  ;;  %s852_s18 = sshll.u32 %s1280_s3, 4  ;;  %s853_s18 = int_to_ptr.vmem [resolvable:$true] %s852_s18 }
  0x2b   :  { %287 = vmatpush.bf16.msra.mxu0 %v893_v49 }
  0x2c   :  { %312 = vmatpush.bf16.msra.mxu2 %v913_v61  ;;  %v497_v61 = vsel %vm495_vm7, 1, %v1278_v3 }
  0x2d   :  { %300 = vmatpush.bf16.msra.mxu1 %v897_v55  ;;  %v1090_v55 = vld [vmem:[#allocation5 + $0x10] sm:$0xff] }
  0x2f   :  { %288 = vmatpush.bf16.msra.mxu0 %v881_v59 }
  0x30   :  { %313 = vmatpush.bf16.msra.mxu2 %v901_v7 }
  0x31   :  { %301 = vmatpush.bf16.msra.mxu1 %v885_v1  ;;  %502 = vperm.xlu2 %1125, %v497_v61   ;;  %v1097_v61 = vld [vmem:[#allocation7 + $0x8] sm:$0xff] }
  0x33   :  { %289 = vmatpush.bf16.msra.mxu0 %v869_v5 }
  0x34   :  { %314 = vmatpush.bf16.msra.mxu2 %v889_v12 }
  0x35   :  { %302 = vmatpush.bf16.msra.mxu1 %v873_v10 }
  0x36   :  { %290 = vmatmul.bf16.vlgmr.msra.gmra.mxu0 %v113_v11 }
  0x37   :  { %478 = vmatpush.bf16.msrb.mxu0 %v1095_v38 }
  0x38   :  { %303 = vmatmul.bf16.vlgmr.msra.gmra.mxu1 %v113_v11  ;;  %315 = vmatpush.bf16.msra.mxu2 %v877_v15 }
  0x3b   :  { %316 = vmatmul.bf16.vlgmr.msra.gmra.mxu2 %v113_v11  ;;  %479 = vmatpush.bf16.msrb.mxu0 %v1094_v51 }
  0x3c   :  { %566 = vmatpush.bf16.xpose.msrb.mxu2 %v1095_v38 }
  0x3f   :  { %480 = vmatpush.bf16.msrb.mxu0 %v1093_v52 }
  0x43   :  { %481 = vmatpush.bf16.msrb.mxu0 %v1092_v53 }
  0x44   :  { %567 = vmatpush.bf16.xpose.msrb.mxu2 %v1094_v51 }
  0x47   :  { %482 = vmatpush.bf16.msrb.mxu0 %v1091_v54 }
  0x4b   :  { %483 = vmatpush.bf16.msrb.mxu0 %v1090_v55 }
  0x4c   :  { %568 = vmatpush.bf16.xpose.msrb.mxu2 %v1093_v52 }
  0x4f   :  { %484 = vmatpush.bf16.msrb.mxu0 %v1089_v56 }
  0x53   :  { %485 = vmatpush.bf16.msrb.mxu0 %v1088_v57 }
  0x54   :  { %569 = vmatpush.bf16.xpose.msrb.mxu2 %v1092_v53 }
  0x5c   :  { %570 = vmatpush.bf16.xpose.msrb.mxu2 %v1091_v54 }
  0x64   :  { %571 = vmatpush.bf16.xpose.msrb.mxu2 %v1090_v55 }
  0x6c   :  { %572 = vmatpush.bf16.xpose.msrb.mxu2 %v1089_v56  ;;  %v1103_v56 = vld [vmem:[#allocation7 + $0x38] sm:$0xff] }
  0x74   :  { %573 = vmatpush.bf16.xpose.msrb.mxu2 %v1088_v57  ;;  %v1101_v57 = vld [vmem:[#allocation7 + $0x28] sm:$0xff] }
  0x83   :  { %v500_v4 = vpop.permute.xlu2 %499 }
  0x84   :  { %vm504_vm8 = vcmp.eq.s32.totalorder %v500_v4, 1 }
  0x8a   :  { %v329_v17 = vpop.permute.xlu0 %328 }
  0x8b   :  { %vm333_vm0 = vcmp.eq.s32.totalorder %v326_v18, %v329_v17  ;;  %v503_v26 = vpop.permute.xlu2 %502 }
  0x8c   :  { %v335_v20 = vsel %vm333_vm0, 1.0, %v1279_v19  ;;  %vm505_vm9 = vcmp.eq.s32.totalorder %v503_v26, 1  ;;  %v1110_v26 = vld [vmem:[#allocation8 + $0x30] sm:$0xff] }
  0x91   :  { %v340_v33 = vpop.permute.xlu1 %339 }
  0x92   :  { %v332_v21 = vpop.permute.xlu0 %331  ;;  %vm344_vm4 = vcmp.eq.s32.totalorder %v326_v18, %v340_v33 }
  0x93   :  { %vm334_vm1 = vcmp.eq.s32.totalorder %v326_v18, %v332_v21  ;;  %v346_v46 = vsel %vm344_vm4, 1.0, %v1279_v19 }
  0x94   :  { %v336_v22 = vsel %vm334_vm1, 1.0, %v1279_v19 }
  0x95   :  { %v1396_v23 = vpack.c.bf16 %v336_v22, %v335_v20 }
  0x97   :  { %532 = vxpose.xlu0.c.b16.start.end [1/1] (short) (narrow) %v1396_v23, 16 }
  0x99   :  { %v343_v41 = vpop.permute.xlu1 %342 }
  0x9a   :  { %vm345_vm5 = vcmp.eq.s32.totalorder %v326_v18, %v343_v41 }
  0x9b   :  { %v347_v47 = vsel %vm345_vm5, 1.0, %v1279_v19 }
  0x9c   :  { %v348_v50 = vpack.c.bf16 %v347_v47, %v346_v46 }
  0xb3   :  { %v291_v28 = vpop.f32.mrf.mxu0 }
  0xb4   :  { %v292_v29 = vadd.f32 %v291_v28, %v148_v25 }
  0xb5   :  { %v304_v30 = vpop.f32.mrf.mxu1 }
  0xb6   :  { %v349_v31 = vpack.c.bf16 %v292_v29, %v292_v29  ;;  %v305_v32 = vadd.f32 %v304_v30, %v149_v27 }
  0xb8   :  { %v356_v34 = vsel %vm354_vm2, %v349_v31, 0  ;;  %v372_v35 = vpack.c.bf16 %v305_v32, %v305_v32 }
  0xb9   :  { %365 = vmatpush.bf16.msra.mxu3 %v356_v34 }
  0xba   :  { %v378_v36 = vsel %vm354_vm2, %v372_v35, 0 }
  0xbb   :  { %v293_v37 = vpop.f32.mrf.mxu0 }
  0xbc   :  { %962 = vmatmul.msk.bf16.vlgmr.msra.gmra.mxu3 %vm350_vm3, %v1396_v23 }
  0xbd   :  { %390 = vmatpush.bf16.msrb.mxu3 %v378_v36  ;;  %v306_v39 = vpop.f32.mrf.mxu1 }
  0xbe   :  { %v317_v42 = vpop.f32.mrf.mxu2 }
  0xbf   :  { %v318_v43 = vadd.f32 %v317_v42, %v150_v40 }
  0xc1   :  { %v373_v44 = vpack.c.bf16 %v318_v43, %v318_v43 }
  0xc3   :  { %v381_v45 = vsel %vm354_vm2, %v373_v44, 0 }
  0xc4   :  { %404 = vmatpush.bf16.msra.mxu3 %v381_v45 }
  0xc6   :  { %v319_v49 = vpop.f32.mrf.mxu2 }
  0xcc   :  { %963 = vmatmul.msk.bf16.vlgmr.msrb.gmra.mxu3 %vm350_vm3, %v348_v50 }
  0xdc   :  { %964 = vmatmul.msk.bf16.vlgmr.msra.gmra.mxu3 %vm350_vm3, %v348_v50 }
 0x13f   :  { %v367_v58 = vpop.f32.mrf.mxu3 }
 0x143   :  { %v540_v36 = vpop.trf.xlu0 }
 0x147   :  { %v369_v59 = vpop.f32.mrf.mxu3 }
 0x14f   :  { %v392_v62 = vpop.f32.mrf.mxu3 }
 0x150   :  { %v411_v0 = vmul.f32 %v392_v62, %v367_v58  ;;  %v1100_v58 = vld [vmem:[#allocation7 + $0x20] sm:$0xff] }
 0x151   :  { %v1096_v62 = vld [vmem:[#allocation7] sm:$0xff] }
 0x157   :  { %v394_v63 = vpop.f32.mrf.mxu3 }
 0x158   :  { %v412_v1 = vmul.f32 %v394_v63, %v369_v59  ;;  %v1099_v59 = vld [vmem:[#allocation7 + $0x18] sm:$0xff] }
 0x15a   :  { %v413_v2 = vpack.c.bf16 %v412_v1, %v411_v0 }
 0x15c   :  { %486 = vmatmul.bf16.vlgmr.msrb.gmra.mxu0 %v413_v2 }
 0x15f   :  { %v406_v44 = vpop.f32.mrf.mxu3 }
 0x167   :  { %v408_v45 = vpop.f32.mrf.mxu3 }
 0x1d9   :  { %v487_v5 = vpop.f32.mrf.mxu0 }
 0x1da   :  { %v492_v7 = vmul.f32 0.35355338, %v487_v5  ;;  %v1111_v5 = vld [vmem:[#allocation8 + $0x38] sm:$0xff] }
 0x1db   :  { %799 = vmatpush.bf16.msra.mxu0 %v1111_v5 }
 0x1dc   :  { %v506_v10 = vsel %vm504_vm8, %v492_v7, -1e+30 }
 0x1df   :  { %800 = vmatpush.bf16.msra.mxu0 %v1110_v26 }
 0x1e1   :  { %v489_v8 = vpop.f32.mrf.mxu0 }
 0x1e2   :  { %v493_v9 = vmul.f32 0.35355338, %v489_v8 }
 0x1e4   :  { %v507_v48 = vsel %vm505_vm9, %v493_v9, -1e+30  ;;  %v1109_v9 = vld [vmem:[#allocation8 + $0x28] sm:$0xff] }
 0x1e5   :  { %v508_v11 = vmax.f32 %v506_v10, %v507_v48  ;;  %801 = vmatpush.bf16.msra.mxu0 %v1109_v9 }
 0x1e7   :  { %v509_v3 = vrot.slane %v508_v11, 4 }
 0x1e9   :  { %v510_v12 = vmax.f32 %v508_v11, %v509_v3  ;;  %v1107_v3 = vld [vmem:[#allocation8 + $0x18] sm:$0xff] }
 0x1eb   :  { %v511_v13 = vrot.slane %v510_v12, 2 }
 0x1ed   :  { %v512_v14 = vmax.f32 %v510_v12, %v511_v13 }
 0x1ef   :  { %v513_v15 = vrot.slane %v512_v14, 1 }
 0x1f1   :  { %v514_v16 = vmax.f32 %v512_v14, %v513_v15  ;;  %v1106_v14 = vld [vmem:[#allocation8 + $0x10] sm:$0xff] }
 0x1f3   :  { %v515_v17 = vsub.f32 %v506_v10, %v514_v16  ;;  %v516_v18 = vsub.f32 %v507_v48, %v514_v16  ;;  %v1108_v10 = vld [vmem:[#allocation8 + $0x20] sm:$0xff] }
 0x1f4   :  { %802 = vmatpush.bf16.msra.mxu0 %v1108_v10 }
 0x1f5   :  { %v517_v19 = vmul.f32 1.442695, %v515_v17  ;;  %v519_v20 = vmul.f32 1.442695, %v516_v18  ;;  %v1126_v18 = vld [vmem:[%s1450_s10] ss:$0 sm:$0xff] }
 0x1f7   :  { %1132 = vpow2.f32 %v517_v19 }
 0x1f8   :  { %1134 = vpow2.f32 %v519_v20  ;;  %803 = vmatpush.bf16.msra.mxu0 %v1107_v3 }
 0x1fc   :  { %804 = vmatpush.bf16.msra.mxu0 %v1106_v14 }
 0x1fd   :  { %v1133_v21 = vpop.eup %1132 }
 0x1fe   :  { %v1135_v22 = vpop.eup %1134 }
 0x1ff   :  { %v521_v24 = vadd.f32 %v1135_v22, %v1133_v21 }
 0x201   :  { %v522_v25 = vrot.slane %v521_v24, 4 }
 0x203   :  { %v523_v27 = vadd.f32 %v522_v25, %v521_v24 }
 0x205   :  { %v524_v28 = vrot.slane %v523_v27, 2 }
 0x207   :  { %v525_v29 = vadd.f32 %v524_v28, %v523_v27  ;;  %v1105_v27 = vld [vmem:[#allocation8 + $0x8] sm:$0xff]  ;;  %v1104_v28 = vld [vmem:[#allocation8] sm:$0xff] }
 0x208   :  { %805 = vmatpush.bf16.msra.mxu0 %v1105_v27 }
 0x209   :  { %v526_v30 = vrot.slane %v525_v29, 1 }
 0x20b   :  { %v527_v31 = vadd.f32 %v526_v30, %v525_v29  ;;  %v1128_v29 = vld [vmem:[%s1447_s7] ss:$0 sm:$0xff] }
 0x20c   :  { %806 = vmatpush.bf16.msra.mxu0 %v1104_v28 }
 0x20d   :  { %1136 = vrcp.f32 %v527_v31 }
 0x213   :  { %v1137_v32 = vpop.eup %1136 }
 0x214   :  { %v529_v33 = vmul.f32 %v1137_v32, %v1133_v21  ;;  %v530_v34 = vmul.f32 %v1137_v32, %v1135_v22  ;;  %v1127_v21 = vld [vmem:[%s1451_s11] ss:$0 sm:$0xff] }
 0x216   :  { %v531_v35 = vpack.c.bf16 %v530_v34, %v529_v33 }
 0x218   :  { %559 = vmatpush.bf16.msrb.mxu1 %v531_v35  ;;  %v1129_v35 = vld [vmem:[%s1449_s9] ss:$0 sm:$0xff] }
 0x21b   :  { %997 = vmatmul.msk.bf16.vlgmr.msrb.gmra.mxu1 %vm548_vm10, %v540_v36 }
 0x298   :  { %v561_v37 = vpop.f32.mrf.mxu1 }
 0x299   :  { %v565_v38 = vpack.c.bf16 %v561_v37, %v561_v37 }
 0x29b   :  { %574 = vmatmul.bf16.vlgmr.msrb.gmra.mxu2 %v565_v38 }
 0x2a0   :  { %v563_v39 = vpop.f32.mrf.mxu1 }
 0x31e   :  { %v575_v40 = vpop.f32.mrf.mxu2 }
 0x31f   :  { %v579_v41 = vpack.c.bf16 %v575_v40, %v575_v40 }
 0x321   :  { %v581_v42 = vsel %vm354_vm2, %v579_v41, 0 }
 0x322   :  { %590 = vmatpush.bf16.msrb.mxu3 %v581_v42 }
 0x325   :  { %998 = vmatmul.msk.bf16.vlgmr.msrb.gmra.mxu3 %vm350_vm3, %v1396_v23  ;;  %v1102_v23 = vld [vmem:[#allocation7 + $0x30] sm:$0xff] }
 0x326   :  { %v577_v43 = vpop.f32.mrf.mxu2  ;;  %716 = vmatpush.bf16.msra.mxu3 %v1103_v56 }
 0x32a   :  { %717 = vmatpush.bf16.msra.mxu3 %v1102_v23  ;;  %v1130_v23 = vld [vmem:[%s1452_s12] ss:$0 sm:$0xff] }
 0x32e   :  { %718 = vmatpush.bf16.msra.mxu3 %v1101_v57 }
 0x332   :  { %719 = vmatpush.bf16.msra.mxu3 %v1100_v58 }
 0x336   :  { %720 = vmatpush.bf16.msra.mxu3 %v1099_v59  ;;  %v1131_v59 = vld [vmem:[%s1453_s13] ss:$0 sm:$0xff] }
 0x33a   :  { %721 = vmatpush.bf16.msra.mxu3 %v1098_v60 }
 0x33e   :  { %722 = vmatpush.bf16.msra.mxu3 %v1097_v61 }
 0x342   :  { %723 = vmatpush.bf16.msra.mxu3 %v1096_v62 }
 0x3a8   :  { %v592_v46 = vpop.f32.mrf.mxu3 }
 0x3a9   :  { %v597_v49 = vmul.f32 %v592_v46, %v406_v44 }
 0x3b0   :  { %v594_v47 = vpop.f32.mrf.mxu3 }
 0x3b1   :  { %v598_v50 = vmul.f32 %v594_v47, %v408_v45 }
 0x3b3   :  { %v599_v51 = vpack.c.bf16 %v598_v50, %v597_v49 }
 0x3b5   :  { %607 = vmatpush.bf16.msra.mxu1 %v599_v51 }
 0x3b8   :  { %999 = vmatmul.msk.bf16.vlgmr.msra.gmra.mxu1 %vm548_vm10, %v540_v36 }
 0x435   :  { %v609_v52 = vpop.f32.mrf.mxu1 }
 0x436   :  { %v613_v53 = vadd.f32 %v609_v52, %v1392_v6 }
 0x438   :  { %614 = vadd.xlane.f32.xlu1 %v613_v53  ;;  %v617_v54 = vmul.f32 %v613_v53, %v613_v53 }
 0x43a   :  { %618 = vadd.xlane.f32.xlu2 %v617_v54 }
 0x43d   :  { %v611_v55 = vpop.f32.mrf.mxu1 }
 0x4ab   :  { %v615_v6 = vpop.xlane.xlu1 %614 }
 0x4ac   :  { %v616_v63 = vmul.f32 0.03125, %v615_v6 }
 0x4ad   :  { %v619_v0 = vpop.xlane.xlu2 %618 }
 0x4ae   :  { %v621_v1 = vmul.f32 %v616_v63, %v616_v63  ;;  %v620_v2 = vmul.f32 0.03125, %v619_v0  ;;  %v624_v17 = vsub.f32 %v613_v53, %v616_v63 }
 0x4b0   :  { %v622_v4 = vsub.f32 %v620_v2, %v621_v1 }
 0x4b2   :  { %v623_v7 = vmax.f32 %v622_v4, 0.0 }
 0x4b4   :  { %v625_v8 = vadd.f32 1e-05, %v623_v7 }
 0x4b6   :  { %1138 = vrsqrt.f32 %v625_v8  ;;  %vm632_vm12 = vweird.f32 %v625_v8 }
 0x4bc   :  { %v1139_v48 = vpop.eup %1138 }
 0x4bd   :  { %v627_v11 = vmul.f32 %v1139_v48, %v625_v8  ;;  %vm633_vm11 = vweird.f32 %v1139_v48 }
 0x4be   :  { %vm634_vm13 = vmor %vm632_vm12, %vm633_vm11 }
 0x4bf   :  { %v628_v12 = vmul.f32 %v1139_v48, %v627_v11 }
 0x4c1   :  { %v629_v13 = vmul.f32 0.5, %v628_v12 }
 0x4c3   :  { %v630_v15 = vsub.f32 1.5, %v629_v13 }
 0x4c5   :  { %v631_v16 = vmul.f32 %v1139_v48, %v630_v15 }
 0x4c7   :  { %v635_v19 = vsel %vm634_vm13, %v1139_v48, %v631_v16 }
 0x4c8   :  { %v636_v20 = vmul.f32 %v635_v19, %v624_v17 }
 0x4ca   :  { %v641_v22 = vmul.f32 %v1126_v18, %v636_v20 }
 0x4cc   :  { %v646_v24 = vadd.f32 %v1127_v21, %v641_v22 }
 0x4ce   :  { %v647_v25 = vpack.c.bf16 %v646_v24, %v646_v24 }
 0x4d0   :  { %724 = vmatmul.bf16.vlgmr.msra.gmra.mxu3 %v647_v25 }
 0x553   :  { %v725_v30 = vpop.f32.mrf.mxu3 }
 0x554   :  { %v726_v31 = vadd.f32 %v1128_v29, %v725_v30 }
 0x556   :  { %v729_v32 = vmax.f32 %v726_v31, 0.0 }
 0x558   :  { %v730_v33 = vpack.c.bf16 %v729_v32, %v729_v32 }
 0x55a   :  { %807 = vmatmul.bf16.vlgmr.msra.gmra.mxu0 %v730_v33 }
 0x55b   :  { %v727_v34 = vpop.f32.mrf.mxu3 }
 0x5d7   :  { %v808_v36 = vpop.f32.mrf.mxu0 }
 0x5d8   :  { %v809_v37 = vadd.f32 %v1129_v35, %v808_v36 }
 0x5da   :  { %v812_v38 = vadd.f32 %v809_v37, %v646_v24 }
 0x5dc   :  { %813 = vadd.xlane.f32.xlu0 %v812_v38  ;;  %v816_v39 = vmul.f32 %v812_v38, %v812_v38 }
 0x5de   :  { %817 = vadd.xlane.f32.xlu2 %v816_v39 }
 0x5df   :  { %v810_v40 = vpop.f32.mrf.mxu0 }
 0x64f   :  { %v814_v41 = vpop.xlane.xlu0 %813 }
 0x650   :  { %v815_v42 = vmul.f32 0.03125, %v814_v41 }
 0x651   :  { %v818_v43 = vpop.xlane.xlu2 %817 }
 0x652   :  { %v820_v44 = vmul.f32 %v815_v42, %v815_v42  ;;  %v819_v45 = vmul.f32 0.03125, %v818_v43  ;;  %v823_v56 = vsub.f32 %v812_v38, %v815_v42 }
 0x654   :  { %v821_v46 = vsub.f32 %v819_v45, %v820_v44 }
 0x656   :  { %v822_v47 = vmax.f32 %v821_v46, 0.0 }
 0x658   :  { %v824_v49 = vadd.f32 1e-05, %v822_v47 }
 0x65a   :  { %1140 = vrsqrt.f32 %v824_v49  ;;  %vm831_vm15 = vweird.f32 %v824_v49 }
 0x660   :  { %v1141_v50 = vpop.eup %1140 }
 0x661   :  { %v826_v51 = vmul.f32 %v1141_v50, %v824_v49  ;;  %vm832_vm14 = vweird.f32 %v1141_v50 }
 0x662   :  { %vm833_vm0 = vmor %vm831_vm15, %vm832_vm14 }
 0x663   :  { %v827_v52 = vmul.f32 %v1141_v50, %v826_v51 }
 0x665   :  { %v828_v53 = vmul.f32 0.5, %v827_v52 }
 0x667   :  { %v829_v54 = vsub.f32 1.5, %v828_v53 }
 0x669   :  { %v830_v55 = vmul.f32 %v1141_v50, %v829_v54 }
 0x66b   :  { %v834_v57 = vsel %vm833_vm0, %v1141_v50, %v830_v55 }
 0x66c   :  { %v835_v58 = vmul.f32 %v834_v57, %v823_v56 }
 0x66e   :  { %v840_v60 = vmul.f32 %v1130_v23, %v835_v58 }
 0x670   :  { %v845_v61 = vadd.f32 %v1131_v59, %v840_v60 }
 0x672   :  { %846 = vst [vmem:[#allocation10] sm:$0xff] %v845_v61 }
 0x673   :  { %857 = dma.vmem_to_hbm [thread:$0]  %s853_s18, 128, %s855_s6, [#allocation4]  }
 0x674   :  { %1268 = dma.done.wait [#allocation4], 128  }
 0x675   :  { %1269 = vsyncadd [#allocation4], 4294967168 }
 0x676   :  { %862 = vsyncpa [#allocation3], 1 }
 0x677   :  { %863 = vsyncpa [#allocation6], 1 }
 0x678   :  { %864 = vsyncpa [#allocation9], 1 }
 0x679   :  { %865 = vsyncpa [#allocation4], 1 }

</bundles_post_ra>
